<compile_context>
chip_gen: v5e
topology: v5e:2x2
jax: 0.10.0
libtpu: 0.0.40
codegen_flags: <defaults>
</compile_context>

<pallas_src>
import jax
import jax.numpy as jnp
from jax import lax
from jax.experimental import pallas as pl
from jax.experimental.pallas import tpu as pltpu

# small, lane-friendly shapes
S, B, I, H, V = 8, 4, 128, 128, 256   # seq, batch, in_dim, hidden, voc_size
BP = 8                                # batch padded to a full sublane group


# ----------------------------------------------------------------------------
# fused kernel: RNN recurrence + ReLU + Linear(hidden -> voc_size)
# ----------------------------------------------------------------------------
def fused_decoder_kernel(x_ref, wxh_ref, whh_ref, bh_ref, wout_ref, bout_ref,
                         logits_ref, states_ref, buf):
    # (1) hoisted input projection + hidden bias: one (S*BP, I) @ (I, H) matmul.
    buf[...] = (
        jnp.dot(x_ref[...], wxh_ref[...], preferred_element_type=jnp.float32)
        + bh_ref[...]
    )

    whh = whh_ref[...]                                   # keep resident in vregs

    # (2) sequential recurrence; only h @ Whh is on the serial path.
    #     buf row-block t holds xproj[t] + bh on entry and relu(h_t) on exit.
    def step(t, h):
        r0 = pl.multiple_of(t * BP, BP)
        pre = buf[pl.ds(r0, BP), :]                      # (BP, H)
        h_new = jnp.tanh(
            pre + jnp.dot(h, whh, preferred_element_type=jnp.float32)
        )
        buf[pl.ds(r0, BP), :] = jnp.maximum(h_new, 0.0)  # F.relu(output)
        return h_new

    h_last = lax.fori_loop(
        0, S, step, jnp.zeros((BP, H), jnp.float32), unroll=True
    )

    # (3) out_layer: one (S*BP, H) @ (H, V) matmul (w_out kept in torch (V, H)
    #     layout, contracted on its last dim) + bias; single lane-dense store.
    logits_ref[...] = (
        lax.dot_general(
            buf[...], wout_ref[...],
            dimension_numbers=(((1,), (1,)), ((), ())),
            preferred_element_type=jnp.float32,
        )
        + bout_ref[...]
    ).astype(logits_ref.dtype)

    states_ref[...] = h_last.astype(states_ref.dtype)


# ----------------------------------------------------------------------------
# FullDecoder.forward
# ----------------------------------------------------------------------------
def full_decoder_forward(x, params):
    # pad batch 4 -> 8 so sublane tiles are full (8, 128) vregs
    xp = jnp.zeros((S, BP, I), x.dtype).at[:, :B, :].set(x)
    x2d = xp.reshape(S * BP, I)
    bh2d = params["bh"].reshape(1, H)
    bout2d = params["b_out"].reshape(1, V)

    logits2d, states_p = pl.pallas_call(
        fused_decoder_kernel,
        out_shape=(
            jax.ShapeDtypeStruct((S * BP, V), jnp.float32),
            jax.ShapeDtypeStruct((BP, H), jnp.float32),
        ),
        scratch_shapes=[pltpu.VMEM((S * BP, H), jnp.float32)],
    )(x2d, params["wxh"], params["whh"], bh2d, params["w_out"], bout2d)

    logits = logits2d.reshape(S, BP, V)[:, :B, :]
    states = states_p[:B, :]
    return logits, states


# ----------------------------------------------------------------------------
# pure-JAX reference for correctness checking
# ----------------------------------------------------------------------------
def reference_forward(x, params):
    def step(h, x_t):
        h_new = jnp.tanh(x_t @ params["wxh"] + h @ params["whh"] + params["bh"][0])
        return h_new, h_new

    h0 = jnp.zeros((B, H), jnp.float32)
    h_last, outs = lax.scan(step, h0, x)                       # outs: (S, B, H)
    logits = jnp.maximum(outs, 0.0) @ params["w_out"].T + params["b_out"]
    return logits, h_last


def init_params(key):
    ks = jax.random.split(key, 5)
    scale = 0.05
    return {
        "wxh": scale * jax.random.normal(ks[0], (I, H), jnp.float32),
        "whh": scale * jax.random.normal(ks[1], (H, H), jnp.float32),
        "bh": scale * jax.random.normal(ks[2], (1, H), jnp.float32),
        # torch Linear weight layout (voc_size, hidden) -- used as-is, no transpose
        "w_out": scale * jax.random.normal(ks[3], (V, H), jnp.float32),
        "b_out": scale * jax.random.normal(ks[4], (V,), jnp.float32),
    }


if __name__ == "__main__":
    key = jax.random.PRNGKey(0)
    k_x, k_p = jax.random.split(key)
    x = jax.random.normal(k_x, (S, B, I), jnp.float32)
    params = init_params(k_p)

    logits, states = jax.jit(full_decoder_forward)(x, params)
    jax.block_until_ready((logits, states))

    ref_logits, ref_states = reference_forward(x, params)
    assert logits.shape == (S, B, V) and states.shape == (B, H)
    assert jnp.allclose(logits, ref_logits, rtol=1e-4, atol=1e-4)
    assert jnp.allclose(states, ref_states, rtol=1e-4, atol=1e-4)

    print("KERNEL_OK")
</pallas_src>

<mosaic_0001>
module attributes {stable_mosaic.version = 11 : i64} {
  func.func @fused_decoder_kernel(%arg0: memref<64x128xf32, #tpu.memory_space<vmem>>, %arg1: memref<128x128xf32, #tpu.memory_space<vmem>>, %arg2: memref<128x128xf32, #tpu.memory_space<vmem>>, %arg3: memref<1x128xf32, #tpu.memory_space<vmem>>, %arg4: memref<256x128xf32, #tpu.memory_space<vmem>>, %arg5: memref<1x256xf32, #tpu.memory_space<vmem>>, %arg6: memref<64x256xf32, #tpu.memory_space<vmem>>, %arg7: memref<8x128xf32, #tpu.memory_space<vmem>>, %arg8: memref<64x128xf32, #tpu.memory_space<vmem>>) attributes {dimension_semantics = [], scalar_prefetch = 0 : i64, scratch_operands = 1 : i64, tpu.core_type = #tpu.core_type<tc>} {
    %c0 = arith.constant 0 : index
    %c0_0 = arith.constant 0 : index
    %0 = vector.load %arg0[%c0, %c0_0] : memref<64x128xf32, #tpu.memory_space<vmem>>, vector<64x128xf32>
    %c0_1 = arith.constant 0 : index
    %c0_2 = arith.constant 0 : index
    %1 = vector.load %arg1[%c0_1, %c0_2] : memref<128x128xf32, #tpu.memory_space<vmem>>, vector<128x128xf32>
    %cst = arith.constant dense<0.000000e+00> : vector<64x128xf32>
    %2 = tpu.matmul %0, %1, %cst {dimension_numbers = #tpu.dot_dimension_numbers<[1], [0], [0], [1], [0, 0, 1, 1], [], []>} : vector<64x128xf32>, vector<128x128xf32>, vector<64x128xf32> -> vector<64x128xf32>
    %c0_3 = arith.constant 0 : index
    %c0_4 = arith.constant 0 : index
    %3 = vector.load %arg3[%c0_3, %c0_4] : memref<1x128xf32, #tpu.memory_space<vmem>>, vector<1x128xf32>
    %4 = vector.broadcast %3 : vector<1x128xf32> to vector<64x128xf32>
    %5 = arith.addf %2, %4 : vector<64x128xf32>
    %c0_5 = arith.constant 0 : index
    %c0_6 = arith.constant 0 : index
    %6 = vector.load %arg8[%c0_5, %c0_6] : memref<64x128xf32, #tpu.memory_space<vmem>>, vector<64x128xf32>
    tpu.vector_store %arg8[%c0_5, %c0_6], %5 {strides = array<i32>} : memref<64x128xf32, #tpu.memory_space<vmem>>, vector<64x128xf32>,
    %c0_7 = arith.constant 0 : index
    %c0_8 = arith.constant 0 : index
    %7 = vector.load %arg2[%c0_7, %c0_8] : memref<128x128xf32, #tpu.memory_space<vmem>>, vector<128x128xf32>
    %cst_9 = arith.constant 0.000000e+00 : f32
    %8 = vector.broadcast %cst_9 : f32 to vector<8x128xf32>
    %c0_i32 = arith.constant 0 : i32
    %c8_i32 = arith.constant 8 : i32
    %9 = arith.muli %c0_i32, %c8_i32 : i32
    %10 = tpu.assume_multiple %9, 8 : i32
    %11 = arith.index_cast %10 : i32 to index
    %c0_10 = arith.constant 0 : index
    %12 = vector.load %arg8[%11, %c0_10] : memref<64x128xf32, #tpu.memory_space<vmem>>, vector<8x128xf32>
    %cst_11 = arith.constant dense<0.000000e+00> : vector<8x128xf32>
    %13 = tpu.matmul %8, %7, %cst_11 {dimension_numbers = #tpu.dot_dimension_numbers<[1], [0], [0], [1], [0, 0, 1, 1], [], []>} : vector<8x128xf32>, vector<128x128xf32>, vector<8x128xf32> -> vector<8x128xf32>
    %14 = arith.addf %12, %13 : vector<8x128xf32>
    %15 = math.tanh %14 : vector<8x128xf32>
    %cst_12 = arith.constant 0.000000e+00 : f32
    %16 = vector.broadcast %cst_12 : f32 to vector<8x128xf32>
    %17 = arith.maximumf %15, %16 : vector<8x128xf32>
    %18 = arith.index_cast %10 : i32 to index
    %c0_13 = arith.constant 0 : index
    %19 = vector.load %arg8[%18, %c0_13] : memref<64x128xf32, #tpu.memory_space<vmem>>, vector<8x128xf32>
    tpu.vector_store %arg8[%18, %c0_13], %17 {strides = array<i32>} : memref<64x128xf32, #tpu.memory_space<vmem>>, vector<8x128xf32>,
    %c1_i32 = arith.constant 1 : i32
    %c8_i32_14 = arith.constant 8 : i32
    %20 = arith.muli %c1_i32, %c8_i32_14 : i32
    %21 = tpu.assume_multiple %20, 8 : i32
    %22 = arith.index_cast %21 : i32 to index
    %c0_15 = arith.constant 0 : index
    %23 = vector.load %arg8[%22, %c0_15] : memref<64x128xf32, #tpu.memory_space<vmem>>, vector<8x128xf32>
    %cst_16 = arith.constant dense<0.000000e+00> : vector<8x128xf32>
    %24 = tpu.matmul %15, %7, %cst_16 {dimension_numbers = #tpu.dot_dimension_numbers<[1], [0], [0], [1], [0, 0, 1, 1], [], []>} : vector<8x128xf32>, vector<128x128xf32>, vector<8x128xf32> -> vector<8x128xf32>
    %25 = arith.addf %23, %24 : vector<8x128xf32>
    %26 = math.tanh %25 : vector<8x128xf32>
    %cst_17 = arith.constant 0.000000e+00 : f32
    %27 = vector.broadcast %cst_17 : f32 to vector<8x128xf32>
    %28 = arith.maximumf %26, %27 : vector<8x128xf32>
    %29 = arith.index_cast %21 : i32 to index
    %c0_18 = arith.constant 0 : index
    %30 = vector.load %arg8[%29, %c0_18] : memref<64x128xf32, #tpu.memory_space<vmem>>, vector<8x128xf32>
    tpu.vector_store %arg8[%29, %c0_18], %28 {strides = array<i32>} : memref<64x128xf32, #tpu.memory_space<vmem>>, vector<8x128xf32>,
    %c2_i32 = arith.constant 2 : i32
    %c8_i32_19 = arith.constant 8 : i32
    %31 = arith.muli %c2_i32, %c8_i32_19 : i32
    %32 = tpu.assume_multiple %31, 8 : i32
    %33 = arith.index_cast %32 : i32 to index
    %c0_20 = arith.constant 0 : index
    %34 = vector.load %arg8[%33, %c0_20] : memref<64x128xf32, #tpu.memory_space<vmem>>, vector<8x128xf32>
    %cst_21 = arith.constant dense<0.000000e+00> : vector<8x128xf32>
    %35 = tpu.matmul %26, %7, %cst_21 {dimension_numbers = #tpu.dot_dimension_numbers<[1], [0], [0], [1], [0, 0, 1, 1], [], []>} : vector<8x128xf32>, vector<128x128xf32>, vector<8x128xf32> -> vector<8x128xf32>
    %36 = arith.addf %34, %35 : vector<8x128xf32>
    %37 = math.tanh %36 : vector<8x128xf32>
    %cst_22 = arith.constant 0.000000e+00 : f32
    %38 = vector.broadcast %cst_22 : f32 to vector<8x128xf32>
    %39 = arith.maximumf %37, %38 : vector<8x128xf32>
    %40 = arith.index_cast %32 : i32 to index
    %c0_23 = arith.constant 0 : index
    %41 = vector.load %arg8[%40, %c0_23] : memref<64x128xf32, #tpu.memory_space<vmem>>, vector<8x128xf32>
    tpu.vector_store %arg8[%40, %c0_23], %39 {strides = array<i32>} : memref<64x128xf32, #tpu.memory_space<vmem>>, vector<8x128xf32>,
    %c3_i32 = arith.constant 3 : i32
    %c8_i32_24 = arith.constant 8 : i32
    %42 = arith.muli %c3_i32, %c8_i32_24 : i32
    %43 = tpu.assume_multiple %42, 8 : i32
    %44 = arith.index_cast %43 : i32 to index
    %c0_25 = arith.constant 0 : index
    %45 = vector.load %arg8[%44, %c0_25] : memref<64x128xf32, #tpu.memory_space<vmem>>, vector<8x128xf32>
    %cst_26 = arith.constant dense<0.000000e+00> : vector<8x128xf32>
    %46 = tpu.matmul %37, %7, %cst_26 {dimension_numbers = #tpu.dot_dimension_numbers<[1], [0], [0], [1], [0, 0, 1, 1], [], []>} : vector<8x128xf32>, vector<128x128xf32>, vector<8x128xf32> -> vector<8x128xf32>
    %47 = arith.addf %45, %46 : vector<8x128xf32>
    %48 = math.tanh %47 : vector<8x128xf32>
    %cst_27 = arith.constant 0.000000e+00 : f32
    %49 = vector.broadcast %cst_27 : f32 to vector<8x128xf32>
    %50 = arith.maximumf %48, %49 : vector<8x128xf32>
    %51 = arith.index_cast %43 : i32 to index
    %c0_28 = arith.constant 0 : index
    %52 = vector.load %arg8[%51, %c0_28] : memref<64x128xf32, #tpu.memory_space<vmem>>, vector<8x128xf32>
    tpu.vector_store %arg8[%51, %c0_28], %50 {strides = array<i32>} : memref<64x128xf32, #tpu.memory_space<vmem>>, vector<8x128xf32>,
    %c4_i32 = arith.constant 4 : i32
    %c8_i32_29 = arith.constant 8 : i32
    %53 = arith.muli %c4_i32, %c8_i32_29 : i32
    %54 = tpu.assume_multiple %53, 8 : i32
    %55 = arith.index_cast %54 : i32 to index
    %c0_30 = arith.constant 0 : index
    %56 = vector.load %arg8[%55, %c0_30] : memref<64x128xf32, #tpu.memory_space<vmem>>, vector<8x128xf32>
    %cst_31 = arith.constant dense<0.000000e+00> : vector<8x128xf32>
    %57 = tpu.matmul %48, %7, %cst_31 {dimension_numbers = #tpu.dot_dimension_numbers<[1], [0], [0], [1], [0, 0, 1, 1], [], []>} : vector<8x128xf32>, vector<128x128xf32>, vector<8x128xf32> -> vector<8x128xf32>
    %58 = arith.addf %56, %57 : vector<8x128xf32>
    %59 = math.tanh %58 : vector<8x128xf32>
    %cst_32 = arith.constant 0.000000e+00 : f32
    %60 = vector.broadcast %cst_32 : f32 to vector<8x128xf32>
    %61 = arith.maximumf %59, %60 : vector<8x128xf32>
    %62 = arith.index_cast %54 : i32 to index
    %c0_33 = arith.constant 0 : index
    %63 = vector.load %arg8[%62, %c0_33] : memref<64x128xf32, #tpu.memory_space<vmem>>, vector<8x128xf32>
    tpu.vector_store %arg8[%62, %c0_33], %61 {strides = array<i32>} : memref<64x128xf32, #tpu.memory_space<vmem>>, vector<8x128xf32>,
    %c5_i32 = arith.constant 5 : i32
    %c8_i32_34 = arith.constant 8 : i32
    %64 = arith.muli %c5_i32, %c8_i32_34 : i32
    %65 = tpu.assume_multiple %64, 8 : i32
    %66 = arith.index_cast %65 : i32 to index
    %c0_35 = arith.constant 0 : index
    %67 = vector.load %arg8[%66, %c0_35] : memref<64x128xf32, #tpu.memory_space<vmem>>, vector<8x128xf32>
    %cst_36 = arith.constant dense<0.000000e+00> : vector<8x128xf32>
    %68 = tpu.matmul %59, %7, %cst_36 {dimension_numbers = #tpu.dot_dimension_numbers<[1], [0], [0], [1], [0, 0, 1, 1], [], []>} : vector<8x128xf32>, vector<128x128xf32>, vector<8x128xf32> -> vector<8x128xf32>
    %69 = arith.addf %67, %68 : vector<8x128xf32>
    %70 = math.tanh %69 : vector<8x128xf32>
    %cst_37 = arith.constant 0.000000e+00 : f32
    %71 = vector.broadcast %cst_37 : f32 to vector<8x128xf32>
    %72 = arith.maximumf %70, %71 : vector<8x128xf32>
    %73 = arith.index_cast %65 : i32 to index
    %c0_38 = arith.constant 0 : index
    %74 = vector.load %arg8[%73, %c0_38] : memref<64x128xf32, #tpu.memory_space<vmem>>, vector<8x128xf32>
    tpu.vector_store %arg8[%73, %c0_38], %72 {strides = array<i32>} : memref<64x128xf32, #tpu.memory_space<vmem>>, vector<8x128xf32>,
    %c6_i32 = arith.constant 6 : i32
    %c8_i32_39 = arith.constant 8 : i32
    %75 = arith.muli %c6_i32, %c8_i32_39 : i32
    %76 = tpu.assume_multiple %75, 8 : i32
    %77 = arith.index_cast %76 : i32 to index
    %c0_40 = arith.constant 0 : index
    %78 = vector.load %arg8[%77, %c0_40] : memref<64x128xf32, #tpu.memory_space<vmem>>, vector<8x128xf32>
    %cst_41 = arith.constant dense<0.000000e+00> : vector<8x128xf32>
    %79 = tpu.matmul %70, %7, %cst_41 {dimension_numbers = #tpu.dot_dimension_numbers<[1], [0], [0], [1], [0, 0, 1, 1], [], []>} : vector<8x128xf32>, vector<128x128xf32>, vector<8x128xf32> -> vector<8x128xf32>
    %80 = arith.addf %78, %79 : vector<8x128xf32>
    %81 = math.tanh %80 : vector<8x128xf32>
    %cst_42 = arith.constant 0.000000e+00 : f32
    %82 = vector.broadcast %cst_42 : f32 to vector<8x128xf32>
    %83 = arith.maximumf %81, %82 : vector<8x128xf32>
    %84 = arith.index_cast %76 : i32 to index
    %c0_43 = arith.constant 0 : index
    %85 = vector.load %arg8[%84, %c0_43] : memref<64x128xf32, #tpu.memory_space<vmem>>, vector<8x128xf32>
    tpu.vector_store %arg8[%84, %c0_43], %83 {strides = array<i32>} : memref<64x128xf32, #tpu.memory_space<vmem>>, vector<8x128xf32>,
    %c7_i32 = arith.constant 7 : i32
    %c8_i32_44 = arith.constant 8 : i32
    %86 = arith.muli %c7_i32, %c8_i32_44 : i32
    %87 = tpu.assume_multiple %86, 8 : i32
    %88 = arith.index_cast %87 : i32 to index
    %c0_45 = arith.constant 0 : index
    %89 = vector.load %arg8[%88, %c0_45] : memref<64x128xf32, #tpu.memory_space<vmem>>, vector<8x128xf32>
    %cst_46 = arith.constant dense<0.000000e+00> : vector<8x128xf32>
    %90 = tpu.matmul %81, %7, %cst_46 {dimension_numbers = #tpu.dot_dimension_numbers<[1], [0], [0], [1], [0, 0, 1, 1], [], []>} : vector<8x128xf32>, vector<128x128xf32>, vector<8x128xf32> -> vector<8x128xf32>
    %91 = arith.addf %89, %90 : vector<8x128xf32>
    %92 = math.tanh %91 : vector<8x128xf32>
    %cst_47 = arith.constant 0.000000e+00 : f32
    %93 = vector.broadcast %cst_47 : f32 to vector<8x128xf32>
    %94 = arith.maximumf %92, %93 : vector<8x128xf32>
    %95 = arith.index_cast %87 : i32 to index
    %c0_48 = arith.constant 0 : index
    %96 = vector.load %arg8[%95, %c0_48] : memref<64x128xf32, #tpu.memory_space<vmem>>, vector<8x128xf32>
    tpu.vector_store %arg8[%95, %c0_48], %94 {strides = array<i32>} : memref<64x128xf32, #tpu.memory_space<vmem>>, vector<8x128xf32>,
    %c8_i32_49 = arith.constant 8 : i32
    %c0_50 = arith.constant 0 : index
    %c0_51 = arith.constant 0 : index
    %97 = vector.load %arg8[%c0_50, %c0_51] : memref<64x128xf32, #tpu.memory_space<vmem>>, vector<64x128xf32>
    %c0_52 = arith.constant 0 : index
    %c0_53 = arith.constant 0 : index
    %98 = vector.load %arg4[%c0_52, %c0_53] : memref<256x128xf32, #tpu.memory_space<vmem>>, vector<256x128xf32>
    %cst_54 = arith.constant dense<0.000000e+00> : vector<64x256xf32>
    %99 = tpu.matmul %97, %98, %cst_54 {dimension_numbers = #tpu.dot_dimension_numbers<[1], [1], [0], [0], [0, 0, 1, 0], [], []>} : vector<64x128xf32>, vector<256x128xf32>, vector<64x256xf32> -> vector<64x256xf32>
    %c0_55 = arith.constant 0 : index
    %c0_56 = arith.constant 0 : index
    %100 = vector.load %arg5[%c0_55, %c0_56] : memref<1x256xf32, #tpu.memory_space<vmem>>, vector<1x256xf32>
    %101 = vector.broadcast %100 : vector<1x256xf32> to vector<64x256xf32>
    %102 = arith.addf %99, %101 : vector<64x256xf32>
    %c0_57 = arith.constant 0 : index
    %c0_58 = arith.constant 0 : index
    %103 = vector.load %arg6[%c0_57, %c0_58] : memref<64x256xf32, #tpu.memory_space<vmem>>, vector<64x256xf32>
    tpu.vector_store %arg6[%c0_57, %c0_58], %102 {strides = array<i32>} : memref<64x256xf32, #tpu.memory_space<vmem>>, vector<64x256xf32>,
    %c0_59 = arith.constant 0 : index
    %c0_60 = arith.constant 0 : index
    %104 = vector.load %arg7[%c0_59, %c0_60] : memref<8x128xf32, #tpu.memory_space<vmem>>, vector<8x128xf32>
    tpu.vector_store %arg7[%c0_59, %c0_60], %92 {strides = array<i32>} : memref<8x128xf32, #tpu.memory_space<vmem>>, vector<8x128xf32>,
    return
  }
}

</mosaic_0001>

<bundles_post_ra>
// kernel: full_decoder_forward.1
= control target key start
LH: loop header
LB: loop body
LE: loop exit
PB: predicated region body
PF: predicated region fallthrough
CT: control target
= control target key end

     0   :  { %13 = vsyncpa [#allocation4], 0  ;;  %s973_s0 = inlined_call_operand.vmem [shape: f32[64,128], index: 0, kind: input, shape index: {}]   ;;  %s974_s1 = inlined_call_operand.hbm [shape: f32[128,128], index: 1, kind: input, shape index: {}]   ;;  %s975_s2 = inlined_call_operand.hbm [shape: f32[128,128], index: 2, kind: input, shape index: {}]   ;;  %s976_s3 = inlined_call_operand.vmem [shape: f32[1,128], index: 3, kind: input, shape index: {}]   ;;  %s977_s4 = inlined_call_operand.hbm [shape: f32[256,128], index: 4, kind: input, shape index: {}]   ;;  %s978_s5 = inlined_call_operand.vmem [shape: f32[1,256], index: 5, kind: input, shape index: {}]   ;;  %s979_s6 = inlined_call_operand.vmem [shape: f32[64,256], index: 6, kind: output, shape index: {0}]   ;;  %s980_s7 = inlined_call_operand.vmem [shape: f32[8,128], index: 7, kind: output, shape index: {1}]  }
   0x1   :  { %14 = vsyncpa [#allocation6], 0  ;;  %s34_s26 = sshll.u32 %s975_s2, 4  ;;  %s626_s27 = smov [#allocation5]   ;;  %s35_s26 = int_to_ptr.hbm [resolvable:$true] %s34_s26 }
   0x2   :  { %s36_s28 = sshll.u32 %s626_s27, 4  ;;  %s21_s8 = sshll.u32 %s974_s1, 4  ;;  %s37_s28 = int_to_ptr.vmem [resolvable:$true] %s36_s28  ;;  %s22_s8 = int_to_ptr.hbm [resolvable:$true] %s21_s8 }
   0x3   :  { %s627_s9 = smov 128   ;;  %s628_s10 = smov 8  }
   0x4   :  { %42 = dma.hbm_to_vmem [thread:$0]  %s35_s26, 2048, %s37_s28, [#allocation6], %s627_s9, %s627_s9, %s628_s10  }
   0x5   :  { %s629_s11 = smov [#allocation3]   ;;  %s49_s15 = sshll.u32 %s977_s4, 4  ;;  %s50_s15 = int_to_ptr.hbm [resolvable:$true] %s49_s15 }
   0x6   :  { %s23_s12 = sshll.u32 %s629_s11, 4  ;;  %s630_s2 = smov [#allocation7]   ;;  %s24_s12 = int_to_ptr.vmem [resolvable:$true] %s23_s12 }
   0x7   :  { %29 = dma.hbm_to_vmem [thread:$0]  %s22_s8, 2048, %s24_s12, [#allocation4], %s627_s9, %s627_s9, %s628_s10  }
   0x8   :  { %s51_s16 = sshll.u32 %s630_s2, 4  ;;  %s52_s16 = int_to_ptr.vmem [resolvable:$true] %s51_s16 }
   0x9   :  { %57 = dma.hbm_to_vmem [thread:$0]  %s50_s15, 4096, %s52_s16, [#allocation6], %s627_s9, %s627_s9, %s628_s10  }
   0xa   :  { %622 = dma.done.wait [#allocation4], 2048  }
   0xb   :  { %623 = vsyncadd [#allocation4], 4294965248 }
   0xc   :  { %624 = dma.done.wait [#allocation6], 6144  }
   0xd   :  { %625 = vsyncadd [#allocation6], 4294961152  ;;  %v95_v0 = vld [vmem:[#allocation3 + $0x78] sm:$0xff]  ;;  %v94_v1 = vld [vmem:[#allocation3 + $0x70] sm:$0xff]  ;;  %v631_v33 = vmov 0.0  }
   0xe   :  { %v681_v2 = vld [vmem:[#allocation5 + $0x78] sm:$0xff]  ;;  %100 = vmatpush.msra.mxu0 %v95_v0  ;;  %v684_v3 = vld [vmem:[#allocation5 + $0x70] sm:$0xff]  ;;  %v93_v4 = vld [vmem:[#allocation3 + $0x68] sm:$0xff] }
   0xf   :  { %166 = vmatpush.msra.mxu1 %v681_v2  ;;  %v686_v5 = vld [vmem:[#allocation5 + $0x68] sm:$0xff]  ;;  %270 = vmatpush.msra.mxu2 %v681_v2  ;;  %v92_v6 = vld [vmem:[#allocation3 + $0x60] sm:$0xff]  ;;  %v91_v8 = vld [vmem:[#allocation3 + $0x58] sm:$0xff] }
  0x10   :  { %296 = vmatpush.msra.mxu3 %v681_v2  ;;  %101 = vmatpush.msra.mxu0 %v94_v1  ;;  %v691_v7 = vld [vmem:[#allocation5 + $0x60] sm:$0xff]  ;;  %v696_v9 = vld [vmem:[#allocation5 + $0x58] sm:$0xff]  ;;  %v90_v10 = vld [vmem:[#allocation3 + $0x50] sm:$0xff] }
  0x11   :  { %167 = vmatpush.msra.mxu1 %v684_v3  ;;  %271 = vmatpush.msra.mxu2 %v684_v3  ;;  %v701_v11 = vld [vmem:[#allocation5 + $0x50] sm:$0xff]  ;;  %v89_v12 = vld [vmem:[#allocation3 + $0x48] sm:$0xff]  ;;  %v88_v14 = vld [vmem:[#allocation3 + $0x40] sm:$0xff] }
  0x12   :  { %297 = vmatpush.msra.mxu3 %v684_v3  ;;  %102 = vmatpush.msra.mxu0 %v93_v4  ;;  %v706_v13 = vld [vmem:[#allocation5 + $0x48] sm:$0xff]  ;;  %v711_v15 = vld [vmem:[#allocation5 + $0x40] sm:$0xff]  ;;  %v87_v16 = vld [vmem:[#allocation3 + $0x38] sm:$0xff] }
  0x13   :  { %168 = vmatpush.msra.mxu1 %v686_v5  ;;  %272 = vmatpush.msra.mxu2 %v686_v5  ;;  %v716_v17 = vld [vmem:[#allocation5 + $0x38] sm:$0xff]  ;;  %v86_v18 = vld [vmem:[#allocation3 + $0x30] sm:$0xff]  ;;  %v85_v20 = vld [vmem:[#allocation3 + $0x28] sm:$0xff] }
  0x14   :  { %298 = vmatpush.msra.mxu3 %v686_v5  ;;  %103 = vmatpush.msra.mxu0 %v92_v6  ;;  %v721_v19 = vld [vmem:[#allocation5 + $0x30] sm:$0xff]  ;;  %v726_v21 = vld [vmem:[#allocation5 + $0x28] sm:$0xff]  ;;  %v84_v22 = vld [vmem:[#allocation3 + $0x20] sm:$0xff] }
  0x15   :  { %169 = vmatpush.msra.mxu1 %v691_v7  ;;  %273 = vmatpush.msra.mxu2 %v691_v7  ;;  %v731_v23 = vld [vmem:[#allocation5 + $0x20] sm:$0xff]  ;;  %v83_v24 = vld [vmem:[#allocation3 + $0x18] sm:$0xff]  ;;  %v82_v26 = vld [vmem:[#allocation3 + $0x10] sm:$0xff] }
  0x16   :  { %299 = vmatpush.msra.mxu3 %v691_v7  ;;  %104 = vmatpush.msra.mxu0 %v91_v8  ;;  %v736_v25 = vld [vmem:[#allocation5 + $0x18] sm:$0xff]  ;;  %v741_v27 = vld [vmem:[#allocation5 + $0x10] sm:$0xff]  ;;  %v81_v28 = vld [vmem:[#allocation3 + $0x8] sm:$0xff] }
  0x17   :  { %170 = vmatpush.msra.mxu1 %v696_v9  ;;  %274 = vmatpush.msra.mxu2 %v696_v9  ;;  %v746_v29 = vld [vmem:[#allocation5 + $0x8] sm:$0xff]  ;;  %v80_v30 = vld [vmem:[#allocation3] sm:$0xff]  ;;  %v74_v35 = vld [vmem:[%s973_s0 + $0x10] sm:$0xff] }
  0x18   :  { %300 = vmatpush.msra.mxu3 %v696_v9  ;;  %105 = vmatpush.msra.mxu0 %v90_v10  ;;  %v751_v31 = vld [vmem:[#allocation5] sm:$0xff]  ;;  %v73_v34 = vld [vmem:[%s973_s0 + $0x8] sm:$0xff]  ;;  %v75_v36 = vld [vmem:[%s973_s0 + $0x18] sm:$0xff] }
  0x19   :  { %171 = vmatpush.msra.mxu1 %v701_v11  ;;  %275 = vmatpush.msra.mxu2 %v701_v11  ;;  %v72_v32 = vld [vmem:[%s973_s0] sm:$0xff]  ;;  %v77_v38 = vld [vmem:[%s973_s0 + $0x28] sm:$0xff]  ;;  %v78_v39 = vld [vmem:[%s973_s0 + $0x30] sm:$0xff] }
  0x1a   :  { %301 = vmatpush.msra.mxu3 %v701_v11  ;;  %106 = vmatpush.msra.mxu0 %v89_v12  ;;  %v76_v37 = vld [vmem:[%s973_s0 + $0x20] sm:$0xff]  ;;  %v79_v40 = vld [vmem:[%s973_s0 + $0x38] sm:$0xff]  ;;  %v394_v59 = vld [vmem:[#allocation7 + $0x70] sm:$0xff] }
  0x1b   :  { %172 = vmatpush.msra.mxu1 %v706_v13  ;;  %276 = vmatpush.msra.mxu2 %v706_v13  ;;  %v852_v41 = vld [vmem:[%s976_s3] ss:$0 sm:$0xff]  ;;  %v395_v58 = vld [vmem:[#allocation7 + $0x78] sm:$0xff]  ;;  %v393_v60 = vld [vmem:[#allocation7 + $0x68] sm:$0xff] }
  0x1c   :  { %302 = vmatpush.msra.mxu3 %v706_v13  ;;  %107 = vmatpush.msra.mxu0 %v88_v14  ;;  %v392_v61 = vld [vmem:[#allocation7 + $0x60] sm:$0xff]  ;;  %v391_v62 = vld [vmem:[#allocation7 + $0x58] sm:$0xff]  ;;  %v390_v63 = vld [vmem:[#allocation7 + $0x50] sm:$0xff] }
  0x1d   :  { %173 = vmatpush.msra.mxu1 %v711_v15  ;;  %277 = vmatpush.msra.mxu2 %v711_v15  ;;  %v388_v4 = vld [vmem:[#allocation7 + $0x40] sm:$0xff]  ;;  %v385_v8 = vld [vmem:[#allocation7 + $0x28] sm:$0xff]  ;;  %v383_v10 = vld [vmem:[#allocation7 + $0x18] sm:$0xff] }
  0x1e   :  { %303 = vmatpush.msra.mxu3 %v711_v15  ;;  %108 = vmatpush.msra.mxu0 %v87_v16  ;;  %v381_v12 = vld [vmem:[#allocation7 + $0x8] sm:$0xff] }
  0x1f   :  { %174 = vmatpush.msra.mxu1 %v716_v17  ;;  %278 = vmatpush.msra.mxu2 %v716_v17 }
  0x20   :  { %304 = vmatpush.msra.mxu3 %v716_v17  ;;  %109 = vmatpush.msra.mxu0 %v86_v18  ;;  %v411_v18 = vld [vmem:[#allocation7 + $0xf8] sm:$0xff] }
  0x21   :  { %175 = vmatpush.msra.mxu1 %v721_v19  ;;  %279 = vmatpush.msra.mxu2 %v721_v19 }
  0x22   :  { %305 = vmatpush.msra.mxu3 %v721_v19  ;;  %110 = vmatpush.msra.mxu0 %v85_v20 }
  0x23   :  { %176 = vmatpush.msra.mxu1 %v726_v21  ;;  %280 = vmatpush.msra.mxu2 %v726_v21 }
  0x24   :  { %306 = vmatpush.msra.mxu3 %v726_v21  ;;  %111 = vmatpush.msra.mxu0 %v84_v22  ;;  %v408_v22 = vld [vmem:[#allocation7 + $0xe0] sm:$0xff] }
  0x25   :  { %177 = vmatpush.msra.mxu1 %v731_v23  ;;  %281 = vmatpush.msra.mxu2 %v731_v23 }
  0x26   :  { %307 = vmatpush.msra.mxu3 %v731_v23  ;;  %112 = vmatpush.msra.mxu0 %v83_v24  ;;  %v407_v24 = vld [vmem:[#allocation7 + $0xd8] sm:$0xff] }
  0x27   :  { %178 = vmatpush.msra.mxu1 %v736_v25  ;;  %282 = vmatpush.msra.mxu2 %v736_v25 }
  0x28   :  { %308 = vmatpush.msra.mxu3 %v736_v25  ;;  %113 = vmatpush.msra.mxu0 %v82_v26 }
  0x29   :  { %179 = vmatpush.msra.mxu1 %v741_v27  ;;  %283 = vmatpush.msra.mxu2 %v741_v27 }
  0x2a   :  { %309 = vmatpush.msra.mxu3 %v741_v27  ;;  %114 = vmatpush.msra.mxu0 %v81_v28  ;;  %v404_v28 = vld [vmem:[#allocation7 + $0xc0] sm:$0xff] }
  0x2b   :  { %180 = vmatpush.msra.mxu1 %v746_v29  ;;  %284 = vmatpush.msra.mxu2 %v746_v29 }
  0x2c   :  { %310 = vmatpush.msra.mxu3 %v746_v29  ;;  %115 = vmatpush.msra.mxu0 %v80_v30  ;;  %v403_v30 = vld [vmem:[#allocation7 + $0xb8] sm:$0xff] }
  0x2d   :  { %181 = vmatpush.msra.mxu1 %v751_v31  ;;  %116 = vmatmul.f32.vlgmr.msra.gmra.mxu0 %v72_v32  ;;  %v401_v32 = vld [vmem:[#allocation7 + $0xa8] sm:$0xff] }
  0x2e   :  { %182 = vmatmul.f32.vlgmr.msra.gmra.mxu1 %v631_v33  ;;  %192 = vmatpush.msrb.mxu0 %v681_v2  ;;  %v400_v33 = vld [vmem:[#allocation7 + $0xa0] sm:$0xff] }
  0x2f   :  { %218 = vmatpush.msrb.mxu1 %v681_v2  ;;  %285 = vmatpush.msra.mxu2 %v751_v31 }
  0x30   :  { %311 = vmatpush.msra.mxu3 %v751_v31  ;;  %193 = vmatpush.msrb.mxu0 %v684_v3 }
  0x31   :  { %219 = vmatpush.msrb.mxu1 %v684_v3  ;;  %418 = vmatpush.xpose.msrb.mxu2 %v395_v58 }
  0x32   :  { %194 = vmatpush.msrb.mxu0 %v686_v5  ;;  %459 = vmatpush.xpose.msrb.mxu3 %v411_v18 }
  0x33   :  { %220 = vmatpush.msrb.mxu1 %v686_v5 }
  0x34   :  { %195 = vmatpush.msrb.mxu0 %v691_v7 }
  0x35   :  { %221 = vmatpush.msrb.mxu1 %v691_v7  ;;  %119 = vmatmul.f32.gmra.mxu0 %v73_v34  ;;  %v399_v34 = vld [vmem:[#allocation7 + $0x98] sm:$0xff] }
  0x36   :  { %196 = vmatpush.msrb.mxu0 %v696_v9  ;;  %419 = vmatpush.xpose.msrb.mxu2 %v394_v59 }
  0x37   :  { %222 = vmatpush.msrb.mxu1 %v696_v9 }
  0x38   :  { %197 = vmatpush.msrb.mxu0 %v701_v11 }
  0x39   :  { %223 = vmatpush.msrb.mxu1 %v701_v11 }
  0x3a   :  { %198 = vmatpush.msrb.mxu0 %v706_v13  ;;  %420 = vmatpush.xpose.msrb.mxu2 %v393_v60 }
  0x3b   :  { %224 = vmatpush.msrb.mxu1 %v706_v13 }
  0x3c   :  { %199 = vmatpush.msrb.mxu0 %v711_v15 }
  0x3d   :  { %225 = vmatpush.msrb.mxu1 %v711_v15  ;;  %122 = vmatmul.f32.gmra.mxu0 %v74_v35  ;;  %v398_v35 = vld [vmem:[#allocation7 + $0x90] sm:$0xff] }
  0x3e   :  { %200 = vmatpush.msrb.mxu0 %v716_v17  ;;  %421 = vmatpush.xpose.msrb.mxu2 %v392_v61 }
  0x3f   :  { %226 = vmatpush.msrb.mxu1 %v716_v17 }
  0x40   :  { %201 = vmatpush.msrb.mxu0 %v721_v19 }
  0x41   :  { %227 = vmatpush.msrb.mxu1 %v721_v19 }
  0x42   :  { %202 = vmatpush.msrb.mxu0 %v726_v21  ;;  %422 = vmatpush.xpose.msrb.mxu2 %v391_v62 }
  0x43   :  { %228 = vmatpush.msrb.mxu1 %v726_v21 }
  0x44   :  { %203 = vmatpush.msrb.mxu0 %v731_v23 }
  0x45   :  { %229 = vmatpush.msrb.mxu1 %v731_v23  ;;  %125 = vmatmul.f32.gmra.mxu0 %v75_v36  ;;  %v397_v36 = vld [vmem:[#allocation7 + $0x88] sm:$0xff] }
  0x46   :  { %204 = vmatpush.msrb.mxu0 %v736_v25  ;;  %423 = vmatpush.xpose.msrb.mxu2 %v390_v63 }
  0x47   :  { %230 = vmatpush.msrb.mxu1 %v736_v25 }
  0x48   :  { %205 = vmatpush.msrb.mxu0 %v741_v27 }
  0x49   :  { %231 = vmatpush.msrb.mxu1 %v741_v27 }
  0x4a   :  { %206 = vmatpush.msrb.mxu0 %v746_v29 }
  0x4b   :  { %232 = vmatpush.msrb.mxu1 %v746_v29 }
  0x4c   :  { %207 = vmatpush.msrb.mxu0 %v751_v31 }
  0x4d   :  { %233 = vmatpush.msrb.mxu1 %v751_v31  ;;  %128 = vmatmul.f32.gmra.mxu0 %v76_v37  ;;  %v396_v37 = vld [vmem:[#allocation7 + $0x80] sm:$0xff] }
  0x4e   :  { %322 = vmatpush.msra.mxu0 %v681_v2 }
  0x4f   :  { %244 = vmatpush.msra.mxu1 %v681_v2 }
  0x50   :  { %323 = vmatpush.msra.mxu0 %v684_v3 }
  0x51   :  { %245 = vmatpush.msra.mxu1 %v684_v3 }
  0x52   :  { %324 = vmatpush.msra.mxu0 %v686_v5 }
  0x53   :  { %246 = vmatpush.msra.mxu1 %v686_v5 }
  0x54   :  { %325 = vmatpush.msra.mxu0 %v691_v7 }
  0x55   :  { %247 = vmatpush.msra.mxu1 %v691_v7  ;;  %131 = vmatmul.f32.gmra.mxu0 %v77_v38 }
  0x56   :  { %326 = vmatpush.msra.mxu0 %v696_v9 }
  0x57   :  { %248 = vmatpush.msra.mxu1 %v696_v9 }
  0x58   :  { %327 = vmatpush.msra.mxu0 %v701_v11 }
  0x59   :  { %249 = vmatpush.msra.mxu1 %v701_v11 }
  0x5a   :  { %328 = vmatpush.msra.mxu0 %v706_v13 }
  0x5b   :  { %250 = vmatpush.msra.mxu1 %v706_v13 }
  0x5c   :  { %329 = vmatpush.msra.mxu0 %v711_v15 }
  0x5d   :  { %251 = vmatpush.msra.mxu1 %v711_v15  ;;  %134 = vmatmul.f32.gmra.mxu0 %v78_v39 }
  0x5e   :  { %330 = vmatpush.msra.mxu0 %v716_v17 }
  0x5f   :  { %252 = vmatpush.msra.mxu1 %v716_v17 }
  0x60   :  { %331 = vmatpush.msra.mxu0 %v721_v19 }
  0x61   :  { %253 = vmatpush.msra.mxu1 %v721_v19 }
  0x62   :  { %332 = vmatpush.msra.mxu0 %v726_v21 }
  0x63   :  { %254 = vmatpush.msra.mxu1 %v726_v21 }
  0x64   :  { %333 = vmatpush.msra.mxu0 %v731_v23 }
  0x65   :  { %255 = vmatpush.msra.mxu1 %v731_v23  ;;  %137 = vmatmul.f32.gmra.mxu0 %v79_v40 }
  0x66   :  { %334 = vmatpush.msra.mxu0 %v736_v25 }
  0x67   :  { %256 = vmatpush.msra.mxu1 %v736_v25 }
  0x68   :  { %335 = vmatpush.msra.mxu0 %v741_v27 }
  0x69   :  { %257 = vmatpush.msra.mxu1 %v741_v27 }
  0x6a   :  { %336 = vmatpush.msra.mxu0 %v746_v29 }
  0x6b   :  { %258 = vmatpush.msra.mxu1 %v746_v29 }
  0x6c   :  { %337 = vmatpush.msra.mxu0 %v751_v31 }
  0x6d   :  { %259 = vmatpush.msra.mxu1 %v751_v31 }
  0xaa   :  { %v117_v42 = vpop.f32.mrf.mxu0 }
  0xab   :  { %v183_v43 = vpop.f32.mrf.mxu1  ;;  %v118_v44 = vadd.f32 %v852_v41, %v117_v42  ;;  %v412_v42 = vld [vmem:[%s978_s5] sm:$0x3] }
  0xac   :  { %v415_v62 = vperm.slane %v412_v42, 1 }
  0xad   :  { %v186_v45 = vadd.f32 %v183_v43, %v118_v44  ;;  %v906_v43 = vperm.slane %v412_v42, 0 }
  0xaf   :  { %534 = vtanh.f32 %v186_v45 }
  0xb2   :  { %v120_v47 = vpop.f32.mrf.mxu0 }
  0xb3   :  { %v121_v54 = vadd.f32 %v852_v41, %v120_v47 }
  0xb5   :  { %v855_v46 = vpop.eup %534 }
  0xb6   :  { %208 = vmatmul.f32.vlgmr.msrb.gmra.mxu0 %v855_v46  ;;  %v188_v20 = vmax.f32 %v855_v46, 0.0 }
  0xba   :  { %v123_v48 = vpop.f32.mrf.mxu0 }
  0xbb   :  { %v124_v0 = vadd.f32 %v852_v41, %v123_v48 }
  0xc2   :  { %v858_v49 = vpop.f32.mrf.mxu0 }
  0xc3   :  { %v127_v14 = vadd.f32 %v852_v41, %v858_v49 }
  0xca   :  { %v860_v50 = vpop.f32.mrf.mxu0 }
  0xcb   :  { %v130_v38 = vadd.f32 %v852_v41, %v860_v50 }
  0xd2   :  { %v862_v51 = vpop.f32.mrf.mxu0 }
  0xda   :  { %v864_v52 = vpop.f32.mrf.mxu0 }
  0xe2   :  { %v866_v53 = vpop.f32.mrf.mxu0 }
 0x133   :  { %v209_v55 = vpop.f32.mrf.mxu0 }
 0x134   :  { %v212_v56 = vadd.f32 %v209_v55, %v121_v54 }
 0x136   :  { %536 = vtanh.f32 %v212_v56 }
 0x13c   :  { %v869_v57 = vpop.eup %536 }
 0x13d   :  { %234 = vmatmul.f32.vlgmr.msrb.gmra.mxu1 %v869_v57 }
 0x13e   :  { %348 = vmatpush.msrb.mxu1 %v681_v2  ;;  %v389_v2 = vld [vmem:[#allocation7 + $0x48] sm:$0xff] }
 0x13f   :  { %424 = vmatpush.xpose.msrb.mxu2 %v389_v2 }
 0x140   :  { %349 = vmatpush.msrb.mxu1 %v684_v3 }
 0x142   :  { %350 = vmatpush.msrb.mxu1 %v686_v5  ;;  %v387_v5 = vld [vmem:[#allocation7 + $0x38] sm:$0xff] }
 0x143   :  { %425 = vmatpush.xpose.msrb.mxu2 %v388_v4 }
 0x144   :  { %351 = vmatpush.msrb.mxu1 %v691_v7  ;;  %v386_v7 = vld [vmem:[#allocation7 + $0x30] sm:$0xff] }
 0x146   :  { %352 = vmatpush.msrb.mxu1 %v696_v9  ;;  %v384_v9 = vld [vmem:[#allocation7 + $0x20] sm:$0xff] }
 0x147   :  { %426 = vmatpush.xpose.msrb.mxu2 %v387_v5 }
 0x148   :  { %353 = vmatpush.msrb.mxu1 %v701_v11  ;;  %v382_v11 = vld [vmem:[#allocation7 + $0x10] sm:$0xff] }
 0x14a   :  { %354 = vmatpush.msrb.mxu1 %v706_v13  ;;  %v380_v13 = vld [vmem:[#allocation7] sm:$0xff] }
 0x14b   :  { %427 = vmatpush.xpose.msrb.mxu2 %v386_v7 }
 0x14c   :  { %355 = vmatpush.msrb.mxu1 %v711_v15 }
 0x14e   :  { %356 = vmatpush.msrb.mxu1 %v716_v17 }
 0x14f   :  { %428 = vmatpush.xpose.msrb.mxu2 %v385_v8 }
 0x150   :  { %357 = vmatpush.msrb.mxu1 %v721_v19  ;;  %v410_v19 = vld [vmem:[#allocation7 + $0xf0] sm:$0xff] }
 0x151   :  { %460 = vmatpush.xpose.msrb.mxu3 %v410_v19 }
 0x152   :  { %358 = vmatpush.msrb.mxu1 %v726_v21  ;;  %v409_v21 = vld [vmem:[#allocation7 + $0xe8] sm:$0xff] }
 0x153   :  { %429 = vmatpush.xpose.msrb.mxu2 %v384_v9 }
 0x154   :  { %359 = vmatpush.msrb.mxu1 %v731_v23  ;;  %v214_v23 = vmax.f32 %v869_v57, 0.0  ;;  %v133_v57 = vadd.f32 %v852_v41, %v862_v51 }
 0x155   :  { %461 = vmatpush.xpose.msrb.mxu3 %v409_v21 }
 0x156   :  { %360 = vmatpush.msrb.mxu1 %v736_v25  ;;  %v406_v25 = vld [vmem:[#allocation7 + $0xd0] sm:$0xff] }
 0x157   :  { %430 = vmatpush.xpose.msrb.mxu2 %v383_v10  ;;  %v136_v10 = vadd.f32 %v852_v41, %v864_v52  ;;  %v139_v52 = vadd.f32 %v852_v41, %v866_v53 }
 0x158   :  { %361 = vmatpush.msrb.mxu1 %v741_v27  ;;  %v405_v27 = vld [vmem:[#allocation7 + $0xc8] sm:$0xff] }
 0x159   :  { %462 = vmatpush.xpose.msrb.mxu3 %v408_v22 }
 0x15a   :  { %362 = vmatpush.msrb.mxu1 %v746_v29 }
 0x15b   :  { %431 = vmatpush.xpose.msrb.mxu2 %v382_v11 }
 0x15c   :  { %363 = vmatpush.msrb.mxu1 %v751_v31  ;;  %v402_v31 = vld [vmem:[#allocation7 + $0xb0] sm:$0xff] }
 0x15d   :  { %463 = vmatpush.xpose.msrb.mxu3 %v407_v24 }
 0x15f   :  { %432 = vmatpush.xpose.msrb.mxu2 %v381_v12 }
 0x161   :  { %464 = vmatpush.xpose.msrb.mxu3 %v406_v25 }
 0x163   :  { %433 = vmatpush.xpose.msrb.mxu2 %v380_v13 }
 0x165   :  { %465 = vmatpush.xpose.msrb.mxu3 %v405_v27 }
 0x169   :  { %466 = vmatpush.xpose.msrb.mxu3 %v404_v28 }
 0x16d   :  { %467 = vmatpush.xpose.msrb.mxu3 %v403_v30 }
 0x171   :  { %468 = vmatpush.xpose.msrb.mxu3 %v402_v31 }
 0x175   :  { %469 = vmatpush.xpose.msrb.mxu3 %v401_v32 }
 0x179   :  { %470 = vmatpush.xpose.msrb.mxu3 %v400_v33 }
 0x17d   :  { %471 = vmatpush.xpose.msrb.mxu3 %v399_v34 }
 0x181   :  { %472 = vmatpush.xpose.msrb.mxu3 %v398_v35 }
 0x185   :  { %473 = vmatpush.xpose.msrb.mxu3 %v397_v36 }
 0x189   :  { %474 = vmatpush.xpose.msrb.mxu3 %v396_v37 }
 0x1ba   :  { %v235_v1 = vpop.f32.mrf.mxu1 }
 0x1bb   :  { %v238_v3 = vadd.f32 %v235_v1, %v124_v0 }
 0x1bd   :  { %538 = vtanh.f32 %v238_v3 }
 0x1c3   :  { %v889_v6 = vpop.eup %538 }
 0x1c4   :  { %260 = vmatmul.f32.vlgmr.msra.gmra.mxu1 %v889_v6  ;;  %v240_v26 = vmax.f32 %v889_v6, 0.0 }
 0x241   :  { %v261_v15 = vpop.f32.mrf.mxu1 }
 0x242   :  { %v264_v16 = vadd.f32 %v261_v15, %v127_v14 }
 0x244   :  { %540 = vtanh.f32 %v264_v16 }
 0x24a   :  { %v894_v17 = vpop.eup %540 }
 0x24b   :  { %286 = vmatmul.f32.vlgmr.msra.gmra.mxu2 %v894_v17  ;;  %v266_v29 = vmax.f32 %v894_v17, 0.0 }
 0x253   :  { %434 = vmatmul.f32.vlgmr.msrb.gmra.mxu2 %v188_v20 }
 0x25b   :  { %437 = vmatmul.f32.gmra.mxu2 %v214_v23 }
 0x263   :  { %440 = vmatmul.f32.gmra.mxu2 %v240_v26 }
 0x26b   :  { %443 = vmatmul.f32.gmra.mxu2 %v266_v29 }
 0x2ce   :  { %v287_v39 = vpop.f32.mrf.mxu2 }
 0x2cf   :  { %v290_v40 = vadd.f32 %v287_v39, %v130_v38 }
 0x2d1   :  { %542 = vtanh.f32 %v290_v40 }
 0x2d6   :  { %v435_v44 = vpop.f32.mrf.mxu2 }
 0x2d7   :  { %v543_v45 = vpop.eup %542  ;;  %v436_v46 = vadd.f32 %v435_v44, %v906_v43 }
 0x2d8   :  { %312 = vmatmul.f32.vlgmr.msra.gmra.mxu3 %v543_v45  ;;  %v292_v47 = vmax.f32 %v543_v45, 0.0 }
 0x2d9   :  { %500 = vst [vmem:[%s979_s6] sm:$0xff] %v436_v46 }
 0x2da   :  { %446 = vmatmul.f32.gmra.mxu2 %v292_v47 }
 0x2de   :  { %v438_v48 = vpop.f32.mrf.mxu2 }
 0x2df   :  { %v439_v49 = vadd.f32 %v438_v48, %v906_v43 }
 0x2e0   :  { %475 = vmatmul.f32.vlgmr.msrb.gmra.mxu3 %v188_v20 }
 0x2e1   :  { %502 = vst [vmem:[%s979_s6 + $0x10] sm:$0xff] %v439_v49 }
 0x2e6   :  { %v441_v50 = vpop.f32.mrf.mxu2 }
 0x2e7   :  { %v442_v54 = vadd.f32 %v441_v50, %v906_v43 }
 0x2e8   :  { %478 = vmatmul.f32.gmra.mxu3 %v214_v23 }
 0x2e9   :  { %504 = vst [vmem:[%s979_s6 + $0x20] sm:$0xff] %v442_v54 }
 0x2ee   :  { %v444_v55 = vpop.f32.mrf.mxu2 }
 0x2ef   :  { %v445_v56 = vadd.f32 %v444_v55, %v906_v43 }
 0x2f0   :  { %481 = vmatmul.f32.gmra.mxu3 %v240_v26 }
 0x2f1   :  { %506 = vst [vmem:[%s979_s6 + $0x30] sm:$0xff] %v445_v56 }
 0x2f8   :  { %484 = vmatmul.f32.gmra.mxu3 %v266_v29 }
 0x300   :  { %487 = vmatmul.f32.gmra.mxu3 %v292_v47 }
 0x35b   :  { %v313_v58 = vpop.f32.mrf.mxu3 }
 0x35c   :  { %v316_v59 = vadd.f32 %v313_v58, %v133_v57 }
 0x35d   :  { %v447_v60 = vpop.f32.mrf.mxu2 }
 0x35e   :  { %544 = vtanh.f32 %v316_v59  ;;  %v448_v61 = vadd.f32 %v447_v60, %v906_v43 }
 0x360   :  { %508 = vst [vmem:[%s979_s6 + $0x40] sm:$0xff] %v448_v61 }
 0x363   :  { %v476_v63 = vpop.f32.mrf.mxu3 }
 0x364   :  { %v545_v0 = vpop.eup %544  ;;  %v477_v1 = vadd.f32 %v476_v63, %v415_v62 }
 0x365   :  { %338 = vmatmul.f32.vlgmr.msra.gmra.mxu0 %v545_v0  ;;  %v318_v2 = vmax.f32 %v545_v0, 0.0 }
 0x366   :  { %501 = vst [vmem:[%s979_s6 + $0x8] sm:$0xff] %v477_v1 }
 0x367   :  { %449 = vmatmul.f32.gmra.mxu2 %v318_v2  ;;  %490 = vmatmul.f32.gmra.mxu3 %v318_v2 }
 0x36b   :  { %v479_v51 = vpop.f32.mrf.mxu3 }
 0x36c   :  { %v480_v3 = vadd.f32 %v479_v51, %v415_v62 }
 0x36e   :  { %503 = vst [vmem:[%s979_s6 + $0x18] sm:$0xff] %v480_v3 }
 0x373   :  { %v482_v4 = vpop.f32.mrf.mxu3 }
 0x374   :  { %v483_v5 = vadd.f32 %v482_v4, %v415_v62 }
 0x376   :  { %505 = vst [vmem:[%s979_s6 + $0x28] sm:$0xff] %v483_v5 }
 0x37b   :  { %v485_v6 = vpop.f32.mrf.mxu3 }
 0x37c   :  { %v486_v7 = vadd.f32 %v485_v6, %v415_v62 }
 0x37e   :  { %507 = vst [vmem:[%s979_s6 + $0x38] sm:$0xff] %v486_v7 }
 0x383   :  { %v488_v8 = vpop.f32.mrf.mxu3 }
 0x384   :  { %v489_v9 = vadd.f32 %v488_v8, %v415_v62 }
 0x386   :  { %509 = vst [vmem:[%s979_s6 + $0x48] sm:$0xff] %v489_v9 }
 0x3e2   :  { %v339_v11 = vpop.f32.mrf.mxu0 }
 0x3e3   :  { %v342_v12 = vadd.f32 %v339_v11, %v136_v10 }
 0x3e5   :  { %546 = vtanh.f32 %v342_v12 }
 0x3ea   :  { %v450_v13 = vpop.f32.mrf.mxu2  ;;  %v491_v14 = vpop.f32.mrf.mxu3 }
 0x3eb   :  { %v547_v15 = vpop.eup %546  ;;  %v451_v16 = vadd.f32 %v450_v13, %v906_v43  ;;  %v492_v17 = vadd.f32 %v491_v14, %v415_v62 }
 0x3ec   :  { %364 = vmatmul.f32.vlgmr.msrb.gmra.mxu1 %v547_v15  ;;  %v344_v18 = vmax.f32 %v547_v15, 0.0 }
 0x3ed   :  { %510 = vst [vmem:[%s979_s6 + $0x50] sm:$0xff] %v451_v16 }
 0x3ee   :  { %511 = vst [vmem:[%s979_s6 + $0x58] sm:$0xff] %v492_v17  ;;  %452 = vmatmul.f32.gmra.mxu2 %v344_v18  ;;  %493 = vmatmul.f32.gmra.mxu3 %v344_v18 }
 0x469   :  { %v365_v19 = vpop.f32.mrf.mxu1 }
 0x46a   :  { %v368_v20 = vadd.f32 %v365_v19, %v139_v52 }
 0x46c   :  { %548 = vtanh.f32 %v368_v20 }
 0x471   :  { %v453_v21 = vpop.f32.mrf.mxu2  ;;  %v494_v22 = vpop.f32.mrf.mxu3 }
 0x472   :  { %v549_v23 = vpop.eup %548  ;;  %v454_v24 = vadd.f32 %v453_v21, %v906_v43  ;;  %v495_v25 = vadd.f32 %v494_v22, %v415_v62 }
 0x473   :  { %516 = vst [vmem:[%s980_s7] sm:$0xff] %v549_v23  ;;  %v370_v26 = vmax.f32 %v549_v23, 0.0 }
 0x474   :  { %512 = vst [vmem:[%s979_s6 + $0x60] sm:$0xff] %v454_v24 }
 0x475   :  { %513 = vst [vmem:[%s979_s6 + $0x68] sm:$0xff] %v495_v25  ;;  %455 = vmatmul.f32.gmra.mxu2 %v370_v26  ;;  %496 = vmatmul.f32.gmra.mxu3 %v370_v26 }
 0x4f8   :  { %v456_v41 = vpop.f32.mrf.mxu2  ;;  %v497_v53 = vpop.f32.mrf.mxu3 }
 0x4f9   :  { %v457_v27 = vadd.f32 %v456_v41, %v906_v43  ;;  %v498_v28 = vadd.f32 %v497_v53, %v415_v62 }
 0x4fb   :  { %514 = vst [vmem:[%s979_s6 + $0x70] sm:$0xff] %v457_v27 }
 0x4fc   :  { %515 = vst [vmem:[%s979_s6 + $0x78] sm:$0xff] %v498_v28 }
 0x4fd   :  { %525 = vsyncpa [#allocation4], 1 }
 0x4fe   :  { %526 = vsyncpa [#allocation6], 1 }

</bundles_post_ra>
